<compile_context>
chip_gen: v6e
topology: v6e:2x2x1
jax: 0.10.0
libtpu: 0.0.40
codegen_flags: <defaults>
</compile_context>

<pallas_src>
import functools

import jax
import jax.numpy as jnp
from jax.experimental import pallas as pl
from jax.experimental.pallas import tpu as pltpu


def _dino_loss_kernel(student_ref, teacher_ref, center_ref,
                      loss_part_ref, center_part_ref, *,
                      n_t, n_s, inv_student_temp, inv_teacher_temp):
    D = center_ref.shape[-1]
    tb = student_ref.shape[1]
    c = center_ref[...].astype(jnp.float32)                        # [1, D]

    # ---- teacher views: centered, temperature-scaled softmax ---------------
    # n_t is small (2 global crops in DINO) so all probs stay live; needed for
    # the diagonal (t_ix == s_ix) correction below.
    p_ts = []
    csum = jnp.zeros((1, D), jnp.float32)
    for v in range(n_t):
        t_raw = teacher_ref[v].astype(jnp.float32)                 # [TB, D]
        csum = csum + jnp.sum(t_raw, axis=0, keepdims=True)        # raw logits
        t = (t_raw - c) * inv_teacher_temp
        t = t - jnp.max(t, axis=-1, keepdims=True)
        t_exp = jnp.exp(t)
        inv_den = pl.reciprocal(jnp.sum(t_exp, axis=-1, keepdims=True),
                                approx=True)                       # EUP
        p_ts.append(t_exp * inv_den)                               # [TB, D]

    big_p = p_ts[0]
    for v in range(1, n_t):
        big_p = big_p + p_ts[v]                                    # sum_t p_t

    # ---- student views: -log_softmax, factored pairwise cross-entropy ------
    #   sum_{t != s} <p_t, -log_p_s> = <sum_t p_t, sum_s -log_p_s> - diagonal
    n_d = min(n_t, n_s)
    big_l = jnp.zeros((tb, D), jnp.float32)
    diag = jnp.zeros((), jnp.float32)
    for v in range(n_s):
        s = student_ref[v].astype(jnp.float32) * inv_student_temp  # [TB, D]
        s = s - jnp.max(s, axis=-1, keepdims=True)
        nl = jnp.log(jnp.sum(jnp.exp(s), axis=-1, keepdims=True)) - s
        big_l = big_l + nl
        if v < n_d:
            diag = diag + jnp.sum(p_ts[v] * nl)

    tile_loss = jnp.sum(big_p * big_l) - diag   # summed over this batch tile

    # Lane-dense (1,1,128) slab -> unmasked vst.
    loss_part_ref[...] = jnp.full(loss_part_ref.shape, tile_loss, jnp.float32)
    # Teacher batch-center partial sum (uncentered logits).
    center_part_ref[...] = csum.reshape(1, 1, D)


def _pick_tile_batch(B, D, n_s, n_t, in_itemsize, vmem_budget):
    """Largest batch tile (multiple of 8, divisor of B) fitting the budget."""
    if B % 8 != 0:
        return B
    best = 8
    for tb in range(8, B + 1, 8):
        if B % tb != 0:
            continue
        stream = (n_s + n_t) * tb * D * in_itemsize * 2   # double-buffered inputs
        interm = (n_t + 4) * tb * D * 4                   # f32 temporaries
        if stream + interm <= vmem_budget:
            best = tb
    return best


def dino_loss(student_views, teacher_views, center, *,
              student_temp=0.1, teacher_temp=0.04, center_momentum=0.9,
              tile_batch=None):
    """Returns (scalar loss, updated center [1, D])."""
    n_s = len(student_views)
    n_t = len(teacher_views)
    B, D = student_views[0].shape

    # Keep HBM dtype of the views (bf16 friendly); center stays f32.
    student = jnp.stack(student_views, axis=0)          # [n_s, B, D]
    teacher = jnp.stack(teacher_views, axis=0)          # [n_t, B, D]
    center = center.astype(jnp.float32)                 # [1, D]

    # Scoped-VMEM limit relative to the chip's physical VMEM
    # (v5e/v6e: 128 MiB physical, v7x: 64 MiB).  Fallback is safe everywhere.
    try:
        vmem_cap = pltpu.get_tpu_info().vmem_capacity_bytes
    except Exception:
        vmem_cap = 64 * 1024 * 1024
    vmem_limit = int(vmem_cap * 3 // 4)

    if tile_batch is None:
        tb = _pick_tile_batch(B, D, n_s, n_t,
                              jnp.dtype(student.dtype).itemsize,
                              vmem_budget=vmem_limit // 2)
    elif B % tile_batch == 0 and (tile_batch % 8 == 0 or tile_batch == B):
        tb = tile_batch
    else:
        tb = B
    grid_b = B // tb

    count = n_t * n_s - min(n_t, n_s)

    kernel = functools.partial(
        _dino_loss_kernel,
        n_t=n_t, n_s=n_s,
        inv_student_temp=1.0 / float(student_temp),
        inv_teacher_temp=1.0 / float(teacher_temp),
    )

    loss_parts, center_parts = pl.pallas_call(
        kernel,
        out_shape=(jax.ShapeDtypeStruct((grid_b, 1, 128), jnp.float32),
                   jax.ShapeDtypeStruct((grid_b, 1, D), jnp.float32)),
        grid=(grid_b,),
        in_specs=[pl.BlockSpec((n_s, tb, D), lambda i: (0, i, 0)),
                  pl.BlockSpec((n_t, tb, D), lambda i: (0, i, 0)),
                  pl.BlockSpec((1, D), lambda i: (0, 0))],
        out_specs=(pl.BlockSpec((1, 1, 128), lambda i: (i, 0, 0)),
                   pl.BlockSpec((1, 1, D), lambda i: (i, 0, 0))),
        compiler_params=pltpu.CompilerParams(
            dimension_semantics=("parallel",),
            vmem_limit_bytes=vmem_limit),
    )(student, teacher, center)

    # Tiny final reductions in JAX (per-tile partials -> scalar / [1, D]).
    loss = jnp.sum(loss_parts[:, 0, 0]) * (1.0 / (B * count))
    batch_center = jnp.sum(center_parts[:, 0, :], axis=0, keepdims=True) \
        * (1.0 / (n_t * B))
    new_center = center * center_momentum + batch_center * (1.0 - center_momentum)
    return loss, new_center


def _reference(student_views, teacher_views, center,
               student_temp, teacher_temp, center_momentum):
    """Pure-JAX mirror of the PyTorch forward() + update_center()."""
    student = [s.astype(jnp.float32) / student_temp for s in student_views]
    teacher = [jax.nn.softmax((t.astype(jnp.float32) - center) / teacher_temp,
                              axis=-1)
               for t in teacher_views]
    loss = 0.0
    count = 0
    for t_ix, t in enumerate(teacher):
        for s_ix, s in enumerate(student):
            if t_ix == s_ix:
                continue
            loss = loss + jnp.mean(jnp.sum(-t * jax.nn.log_softmax(s, axis=-1),
                                           axis=-1))
            count += 1
    loss = loss / count
    batch_center = jnp.mean(
        jnp.concatenate([t.astype(jnp.float32) for t in teacher_views], axis=0),
        axis=0, keepdims=True)
    new_center = center * center_momentum + batch_center * (1.0 - center_momentum)
    return loss, new_center


if __name__ == "__main__":
    # Small deterministic example: 2 teacher (global) views, 4 student views.
    B = 16          # batch
    D = 256         # out_dim of the DINO projection head (lane-dense: % 128 == 0)
    n_teacher = 2
    n_student = 4

    student_temp = 0.1
    teacher_temp = 0.04      # config.teacher_temp_start
    center_momentum = 0.9

    key = jax.random.PRNGKey(0)
    keys = jax.random.split(key, n_teacher + n_student)
    teacher_views = [jax.random.normal(keys[i], (B, D), dtype=jnp.float32)
                     for i in range(n_teacher)]
    student_views = [jax.random.normal(keys[n_teacher + i], (B, D),
                                       dtype=jnp.float32)
                     for i in range(n_student)]
    center = jnp.zeros((1, D), dtype=jnp.float32)   # register_buffer init

    ref_loss, ref_center = _reference(
        student_views, teacher_views, center,
        student_temp, teacher_temp, center_momentum)

    # --- f32 path, auto batch tile (single tile here) ------------------------
    loss, new_center = dino_loss(
        student_views, teacher_views, center,
        student_temp=student_temp, teacher_temp=teacher_temp,
        center_momentum=center_momentum)
    jax.block_until_ready((loss, new_center))
    # loss uses EUP approx reciprocal in the teacher softmax -> slightly looser
    assert jnp.allclose(loss, ref_loss, rtol=5e-3, atol=5e-3), (loss, ref_loss)
    assert jnp.allclose(new_center, ref_center, rtol=1e-5, atol=1e-5)

    # --- f32 path, explicit 8-row tiles (exercises the multi-tile grid) ------
    loss_t8, center_t8 = dino_loss(
        student_views, teacher_views, center,
        student_temp=student_temp, teacher_temp=teacher_temp,
        center_momentum=center_momentum, tile_batch=8)
    jax.block_until_ready((loss_t8, center_t8))
    assert jnp.allclose(loss_t8, ref_loss, rtol=5e-3, atol=5e-3)
    assert jnp.allclose(center_t8, ref_center, rtol=1e-5, atol=1e-5)

    # --- bf16-in-HBM streaming path (smoke test: runs clean, finite output) --
    loss_bf16, center_bf16 = dino_loss(
        [s.astype(jnp.bfloat16) for s in student_views],
        [t.astype(jnp.bfloat16) for t in teacher_views],
        center,
        student_temp=student_temp, teacher_temp=teacher_temp,
        center_momentum=center_momentum, tile_batch=8)
    jax.block_until_ready((loss_bf16, center_bf16))
    assert bool(jnp.isfinite(loss_bf16)) and bool(jnp.all(jnp.isfinite(center_bf16)))

    print("KERNEL_OK")
</pallas_src>

<mosaic_0001>
module attributes {stable_mosaic.version = 11 : i64} {
  func.func @_dino_loss_kernel(%arg0: i32, %arg1: memref<4x16x256xf32, #tpu.memory_space<vmem>>, %arg2: memref<2x16x256xf32, #tpu.memory_space<vmem>>, %arg3: memref<1x256xf32, #tpu.memory_space<vmem>>, %arg4: memref<1x1x128xf32, #tpu.memory_space<vmem>>, %arg5: memref<1x1x256xf32, #tpu.memory_space<vmem>>) attributes {dimension_semantics = [#tpu.dimension_semantics<parallel>], iteration_bounds = array<i64: 1>, scalar_prefetch = 0 : i64, scratch_operands = 0 : i64, tpu.core_type = #tpu.core_type<tc>, window_params = [{transform_indices = @transform_0, window_bounds = array<i64: 4, 16, 256>}, {transform_indices = @transform_1, window_bounds = array<i64: 2, 16, 256>}, {pipeline_mode = #tpu.pipeline_mode<synchronous>, transform_indices = @transform_2, window_bounds = array<i64: 1, 256>}, {transform_indices = @transform_3, window_bounds = array<i64: 1, 1, 128>}, {transform_indices = @transform_4, window_bounds = array<i64: 1, 1, 256>}]} {
    %c0 = arith.constant 0 : index
    %c0_0 = arith.constant 0 : index
    %0 = vector.load %arg3[%c0, %c0_0] : memref<1x256xf32, #tpu.memory_space<vmem>>, vector<1x256xf32>
    %cst = arith.constant 0.000000e+00 : f32
    %1 = vector.broadcast %cst : f32 to vector<1x256xf32>
    %c0_1 = arith.constant 0 : index
    %c0_2 = arith.constant 0 : index
    %c0_3 = arith.constant 0 : index
    %2 = vector.load %arg2[%c0_1, %c0_2, %c0_3] : memref<2x16x256xf32, #tpu.memory_space<vmem>>, vector<1x16x256xf32>
    %3 = vector.shape_cast %2 : vector<1x16x256xf32> to vector<16x256xf32>
    %cst_4 = arith.constant dense<0.000000e+00> : vector<256xf32>
    %4 = vector.multi_reduction <add>, %3, %cst_4 [0] : vector<16x256xf32> to vector<256xf32>
    %5 = vector.shape_cast %4 : vector<256xf32> to vector<1x256xf32>
    %6 = arith.addf %1, %5 : vector<1x256xf32>
    %7 = vector.broadcast %0 : vector<1x256xf32> to vector<16x256xf32>
    %8 = arith.subf %3, %7 : vector<16x256xf32>
    %cst_5 = arith.constant 2.500000e+01 : f32
    %9 = vector.broadcast %cst_5 : f32 to vector<16x256xf32>
    %10 = arith.mulf %8, %9 : vector<16x256xf32>
    %cst_6 = arith.constant dense<0xFF800000> : vector<16xf32>
    %11 = vector.multi_reduction <maximumf>, %10, %cst_6 [1] : vector<16x256xf32> to vector<16xf32>
    %12 = vector.shape_cast %11 : vector<16xf32> to vector<16x1xf32>
    %13 = vector.broadcast %12 : vector<16x1xf32> to vector<16x256xf32>
    %14 = arith.subf %10, %13 : vector<16x256xf32>
    %15 = math.exp %14 : vector<16x256xf32>
    %cst_7 = arith.constant dense<0.000000e+00> : vector<16xf32>
    %16 = vector.multi_reduction <add>, %15, %cst_7 [1] : vector<16x256xf32> to vector<16xf32>
    %17 = vector.shape_cast %16 : vector<16xf32> to vector<16x1xf32>
    %18 = tpu.reciprocal %17 {approx = true} : vector<16x1xf32> -> vector<16x1xf32>
    %19 = vector.broadcast %18 : vector<16x1xf32> to vector<16x256xf32>
    %20 = arith.mulf %15, %19 : vector<16x256xf32>
    %c1 = arith.constant 1 : index
    %c0_8 = arith.constant 0 : index
    %c0_9 = arith.constant 0 : index
    %21 = vector.load %arg2[%c1, %c0_8, %c0_9] : memref<2x16x256xf32, #tpu.memory_space<vmem>>, vector<1x16x256xf32>
    %22 = vector.shape_cast %21 : vector<1x16x256xf32> to vector<16x256xf32>
    %cst_10 = arith.constant dense<0.000000e+00> : vector<256xf32>
    %23 = vector.multi_reduction <add>, %22, %cst_10 [0] : vector<16x256xf32> to vector<256xf32>
    %24 = vector.shape_cast %23 : vector<256xf32> to vector<1x256xf32>
    %25 = arith.addf %6, %24 : vector<1x256xf32>
    %26 = vector.broadcast %0 : vector<1x256xf32> to vector<16x256xf32>
    %27 = arith.subf %22, %26 : vector<16x256xf32>
    %cst_11 = arith.constant 2.500000e+01 : f32
    %28 = vector.broadcast %cst_11 : f32 to vector<16x256xf32>
    %29 = arith.mulf %27, %28 : vector<16x256xf32>
    %cst_12 = arith.constant dense<0xFF800000> : vector<16xf32>
    %30 = vector.multi_reduction <maximumf>, %29, %cst_12 [1] : vector<16x256xf32> to vector<16xf32>
    %31 = vector.shape_cast %30 : vector<16xf32> to vector<16x1xf32>
    %32 = vector.broadcast %31 : vector<16x1xf32> to vector<16x256xf32>
    %33 = arith.subf %29, %32 : vector<16x256xf32>
    %34 = math.exp %33 : vector<16x256xf32>
    %cst_13 = arith.constant dense<0.000000e+00> : vector<16xf32>
    %35 = vector.multi_reduction <add>, %34, %cst_13 [1] : vector<16x256xf32> to vector<16xf32>
    %36 = vector.shape_cast %35 : vector<16xf32> to vector<16x1xf32>
    %37 = tpu.reciprocal %36 {approx = true} : vector<16x1xf32> -> vector<16x1xf32>
    %38 = vector.broadcast %37 : vector<16x1xf32> to vector<16x256xf32>
    %39 = arith.mulf %34, %38 : vector<16x256xf32>
    %40 = arith.addf %20, %39 : vector<16x256xf32>
    %cst_14 = arith.constant 0.000000e+00 : f32
    %41 = vector.broadcast %cst_14 : f32 to vector<16x256xf32>
    %c0_15 = arith.constant 0 : index
    %c0_16 = arith.constant 0 : index
    %c0_17 = arith.constant 0 : index
    %42 = vector.load %arg1[%c0_15, %c0_16, %c0_17] : memref<4x16x256xf32, #tpu.memory_space<vmem>>, vector<1x16x256xf32>
    %43 = vector.shape_cast %42 : vector<1x16x256xf32> to vector<16x256xf32>
    %cst_18 = arith.constant 1.000000e+01 : f32
    %44 = vector.broadcast %cst_18 : f32 to vector<16x256xf32>
    %45 = arith.mulf %43, %44 : vector<16x256xf32>
    %cst_19 = arith.constant dense<0xFF800000> : vector<16xf32>
    %46 = vector.multi_reduction <maximumf>, %45, %cst_19 [1] : vector<16x256xf32> to vector<16xf32>
    %47 = vector.shape_cast %46 : vector<16xf32> to vector<16x1xf32>
    %48 = vector.broadcast %47 : vector<16x1xf32> to vector<16x256xf32>
    %49 = arith.subf %45, %48 : vector<16x256xf32>
    %50 = math.exp %49 : vector<16x256xf32>
    %cst_20 = arith.constant dense<0.000000e+00> : vector<16xf32>
    %51 = vector.multi_reduction <add>, %50, %cst_20 [1] : vector<16x256xf32> to vector<16xf32>
    %52 = vector.shape_cast %51 : vector<16xf32> to vector<16x1xf32>
    %53 = math.log %52 : vector<16x1xf32>
    %54 = vector.broadcast %53 : vector<16x1xf32> to vector<16x256xf32>
    %55 = arith.subf %54, %49 : vector<16x256xf32>
    %56 = arith.addf %41, %55 : vector<16x256xf32>
    %57 = arith.mulf %20, %55 : vector<16x256xf32>
    %58 = vector.shape_cast %57 : vector<16x256xf32> to vector<1x16x256xf32>
    %cst_21 = arith.constant dense<0.000000e+00> : vector<1xf32>
    %59 = vector.multi_reduction <add>, %58, %cst_21 [1, 2] : vector<1x16x256xf32> to vector<1xf32>
    %60 = vector.shape_cast %59 : vector<1xf32> to vector<1x1x1xf32>
    %61 = vector.extract %60[0, 0, 0] : f32 from vector<1x1x1xf32>
    %cst_22 = arith.constant 0.000000e+00 : f32
    %62 = arith.addf %cst_22, %61 : f32
    %c1_23 = arith.constant 1 : index
    %c0_24 = arith.constant 0 : index
    %c0_25 = arith.constant 0 : index
    %63 = vector.load %arg1[%c1_23, %c0_24, %c0_25] : memref<4x16x256xf32, #tpu.memory_space<vmem>>, vector<1x16x256xf32>
    %64 = vector.shape_cast %63 : vector<1x16x256xf32> to vector<16x256xf32>
    %cst_26 = arith.constant 1.000000e+01 : f32
    %65 = vector.broadcast %cst_26 : f32 to vector<16x256xf32>
    %66 = arith.mulf %64, %65 : vector<16x256xf32>
    %cst_27 = arith.constant dense<0xFF800000> : vector<16xf32>
    %67 = vector.multi_reduction <maximumf>, %66, %cst_27 [1] : vector<16x256xf32> to vector<16xf32>
    %68 = vector.shape_cast %67 : vector<16xf32> to vector<16x1xf32>
    %69 = vector.broadcast %68 : vector<16x1xf32> to vector<16x256xf32>
    %70 = arith.subf %66, %69 : vector<16x256xf32>
    %71 = math.exp %70 : vector<16x256xf32>
    %cst_28 = arith.constant dense<0.000000e+00> : vector<16xf32>
    %72 = vector.multi_reduction <add>, %71, %cst_28 [1] : vector<16x256xf32> to vector<16xf32>
    %73 = vector.shape_cast %72 : vector<16xf32> to vector<16x1xf32>
    %74 = math.log %73 : vector<16x1xf32>
    %75 = vector.broadcast %74 : vector<16x1xf32> to vector<16x256xf32>
    %76 = arith.subf %75, %70 : vector<16x256xf32>
    %77 = arith.addf %56, %76 : vector<16x256xf32>
    %78 = arith.mulf %39, %76 : vector<16x256xf32>
    %79 = vector.shape_cast %78 : vector<16x256xf32> to vector<1x16x256xf32>
    %cst_29 = arith.constant dense<0.000000e+00> : vector<1xf32>
    %80 = vector.multi_reduction <add>, %79, %cst_29 [1, 2] : vector<1x16x256xf32> to vector<1xf32>
    %81 = vector.shape_cast %80 : vector<1xf32> to vector<1x1x1xf32>
    %82 = vector.extract %81[0, 0, 0] : f32 from vector<1x1x1xf32>
    %83 = arith.addf %62, %82 : f32
    %c2 = arith.constant 2 : index
    %c0_30 = arith.constant 0 : index
    %c0_31 = arith.constant 0 : index
    %84 = vector.load %arg1[%c2, %c0_30, %c0_31] : memref<4x16x256xf32, #tpu.memory_space<vmem>>, vector<1x16x256xf32>
    %85 = vector.shape_cast %84 : vector<1x16x256xf32> to vector<16x256xf32>
    %cst_32 = arith.constant 1.000000e+01 : f32
    %86 = vector.broadcast %cst_32 : f32 to vector<16x256xf32>
    %87 = arith.mulf %85, %86 : vector<16x256xf32>
    %cst_33 = arith.constant dense<0xFF800000> : vector<16xf32>
    %88 = vector.multi_reduction <maximumf>, %87, %cst_33 [1] : vector<16x256xf32> to vector<16xf32>
    %89 = vector.shape_cast %88 : vector<16xf32> to vector<16x1xf32>
    %90 = vector.broadcast %89 : vector<16x1xf32> to vector<16x256xf32>
    %91 = arith.subf %87, %90 : vector<16x256xf32>
    %92 = math.exp %91 : vector<16x256xf32>
    %cst_34 = arith.constant dense<0.000000e+00> : vector<16xf32>
    %93 = vector.multi_reduction <add>, %92, %cst_34 [1] : vector<16x256xf32> to vector<16xf32>
    %94 = vector.shape_cast %93 : vector<16xf32> to vector<16x1xf32>
    %95 = math.log %94 : vector<16x1xf32>
    %96 = vector.broadcast %95 : vector<16x1xf32> to vector<16x256xf32>
    %97 = arith.subf %96, %91 : vector<16x256xf32>
    %98 = arith.addf %77, %97 : vector<16x256xf32>
    %c3 = arith.constant 3 : index
    %c0_35 = arith.constant 0 : index
    %c0_36 = arith.constant 0 : index
    %99 = vector.load %arg1[%c3, %c0_35, %c0_36] : memref<4x16x256xf32, #tpu.memory_space<vmem>>, vector<1x16x256xf32>
    %100 = vector.shape_cast %99 : vector<1x16x256xf32> to vector<16x256xf32>
    %cst_37 = arith.constant 1.000000e+01 : f32
    %101 = vector.broadcast %cst_37 : f32 to vector<16x256xf32>
    %102 = arith.mulf %100, %101 : vector<16x256xf32>
    %cst_38 = arith.constant dense<0xFF800000> : vector<16xf32>
    %103 = vector.multi_reduction <maximumf>, %102, %cst_38 [1] : vector<16x256xf32> to vector<16xf32>
    %104 = vector.shape_cast %103 : vector<16xf32> to vector<16x1xf32>
    %105 = vector.broadcast %104 : vector<16x1xf32> to vector<16x256xf32>
    %106 = arith.subf %102, %105 : vector<16x256xf32>
    %107 = math.exp %106 : vector<16x256xf32>
    %cst_39 = arith.constant dense<0.000000e+00> : vector<16xf32>
    %108 = vector.multi_reduction <add>, %107, %cst_39 [1] : vector<16x256xf32> to vector<16xf32>
    %109 = vector.shape_cast %108 : vector<16xf32> to vector<16x1xf32>
    %110 = math.log %109 : vector<16x1xf32>
    %111 = vector.broadcast %110 : vector<16x1xf32> to vector<16x256xf32>
    %112 = arith.subf %111, %106 : vector<16x256xf32>
    %113 = arith.addf %98, %112 : vector<16x256xf32>
    %114 = arith.mulf %40, %113 : vector<16x256xf32>
    %115 = vector.shape_cast %114 : vector<16x256xf32> to vector<1x16x256xf32>
    %cst_40 = arith.constant dense<0.000000e+00> : vector<1xf32>
    %116 = vector.multi_reduction <add>, %115, %cst_40 [1, 2] : vector<1x16x256xf32> to vector<1xf32>
    %117 = vector.shape_cast %116 : vector<1xf32> to vector<1x1x1xf32>
    %118 = vector.extract %117[0, 0, 0] : f32 from vector<1x1x1xf32>
    %119 = arith.subf %118, %83 : f32
    %120 = vector.broadcast %119 : f32 to vector<1x1x128xf32>
    %c0_41 = arith.constant 0 : index
    %c0_42 = arith.constant 0 : index
    %c0_43 = arith.constant 0 : index
    %121 = vector.load %arg4[%c0_41, %c0_42, %c0_43] : memref<1x1x128xf32, #tpu.memory_space<vmem>>, vector<1x1x128xf32>
    tpu.vector_store %arg4[%c0_41, %c0_42, %c0_43], %120 {strides = array<i32>} : memref<1x1x128xf32, #tpu.memory_space<vmem>>, vector<1x1x128xf32>,
    %122 = vector.shape_cast %25 : vector<1x256xf32> to vector<1x1x256xf32>
    %c0_44 = arith.constant 0 : index
    %c0_45 = arith.constant 0 : index
    %c0_46 = arith.constant 0 : index
    %123 = vector.load %arg5[%c0_44, %c0_45, %c0_46] : memref<1x1x256xf32, #tpu.memory_space<vmem>>, vector<1x1x256xf32>
    tpu.vector_store %arg5[%c0_44, %c0_45, %c0_46], %122 {strides = array<i32>} : memref<1x1x256xf32, #tpu.memory_space<vmem>>, vector<1x1x256xf32>,
    return
  }
  func.func @transform_0(%arg0: i32) -> (i32, i32, i32) {
    %c0_i32 = arith.constant 0 : i32
    %c0_i32_0 = arith.constant 0 : i32
    %c0_i32_1 = arith.constant 0 : i32
    return %c0_i32, %arg0, %c0_i32_0 : i32, i32, i32
  }
  func.func @transform_1(%arg0: i32) -> (i32, i32, i32) {
    %c0_i32 = arith.constant 0 : i32
    %c0_i32_0 = arith.constant 0 : i32
    %c0_i32_1 = arith.constant 0 : i32
    return %c0_i32, %arg0, %c0_i32_0 : i32, i32, i32
  }
  func.func @transform_2(%arg0: i32) -> (i32, i32) {
    %c0_i32 = arith.constant 0 : i32
    %c0_i32_0 = arith.constant 0 : i32
    %c0_i32_1 = arith.constant 0 : i32
    return %c0_i32, %c0_i32_0 : i32, i32
  }
  func.func @transform_3(%arg0: i32) -> (i32, i32, i32) {
    %c0_i32 = arith.constant 0 : i32
    %c0_i32_0 = arith.constant 0 : i32
    %c0_i32_1 = arith.constant 0 : i32
    return %arg0, %c0_i32, %c0_i32_0 : i32, i32, i32
  }
  func.func @transform_4(%arg0: i32) -> (i32, i32, i32) {
    %c0_i32 = arith.constant 0 : i32
    %c0_i32_0 = arith.constant 0 : i32
    %c0_i32_1 = arith.constant 0 : i32
    return %arg0, %c0_i32, %c0_i32_0 : i32, i32, i32
  }
}

</mosaic_0001>

<bundles_post_ra>
// kernel: tpu_custom_call.1
= control target key start
LH: loop header
LB: loop body
LE: loop exit
PB: predicated region body
PF: predicated region fallthrough
CT: control target
= control target key end

     0   :  { %10 = vsyncpa [#allocation3], 0  ;;  %s899_s0 = inlined_call_operand.hbm [shape: f32[4,16,256], index: 0, kind: input, shape index: {}]   ;;  %s900_s1 = inlined_call_operand.hbm [shape: f32[2,16,256], index: 1, kind: input, shape index: {}]   ;;  %s901_s2 = inlined_call_operand.vmem [shape: f32[1,256], index: 2, kind: input, shape index: {}]   ;;  %s902_s3 = inlined_call_operand.hbm [shape: f32[1,1,128], index: 3, kind: output, shape index: {0}]   ;;  %s903_s4 = inlined_call_operand.hbm [shape: f32[1,1,256], index: 4, kind: output, shape index: {1}]  }
   0x1   :  { %11 = vsyncpa [#allocation6], 0 }
   0x2   :  { %12 = vsyncpa [#allocation4], 0 }
   0x3   :  { %13 = vsyncpa [#allocation9], 0  ;;  %s637_s15 = smov [#allocation2]  }
   0x4   :  { %s19_s16 = sshll.u32 %s637_s15, 4  ;;  %s20_s16 = int_to_ptr.vmem [resolvable:$true] %s19_s16 }
   0x5   :  { %s557_s17 = scalar_lea.vmem %s20_s16, 2048  ;;  %p562_p1 = scmp.lt.s32.totalorder %s20_s16, %s20_s16 }
   0x6   :  { %p558_p0 = scmp.ne.s32.totalorder %s20_s16, %s557_s17  ;;  %p563_p2 = scmp.lt.s32.totalorder %s557_s17, %s557_s17 }
   0x8   :  { %p564_p3 = por %p563_p2, %p562_p1 }
   0xa   :  { %p565_p4 = pnand %p564_p3, %p558_p0 }
   0xc   :  { %568 = shalt.err (!%p565_p4)
}
   0xd   :  { %s638_s18 = smov 256   ;;  %s639_s19 = smov 16  }
   0xe   :  { %25 = dma.hbm_to_vmem [thread:$0]  %s899_s0, 2048, %s20_s16, [#allocation3], %s638_s18, %s638_s18, %s639_s19  }
   0xf   :  { %s640_s22 = smov [#allocation5]  }
  0x10   :  { %s31_s23 = sshll.u32 %s640_s22, 4  ;;  %s32_s23 = int_to_ptr.vmem [resolvable:$true] %s31_s23 }
  0x11   :  { %s577_s24 = scalar_lea.vmem %s32_s23, 1024  ;;  %p582_p6 = scmp.lt.s32.totalorder %s32_s23, %s32_s23 }
  0x12   :  { %p578_p5 = scmp.ne.s32.totalorder %s32_s23, %s577_s24  ;;  %p583_p7 = scmp.lt.s32.totalorder %s577_s24, %s577_s24 }
  0x14   :  { %p584_p8 = por %p583_p7, %p582_p6 }
  0x16   :  { %p585_p9 = pnand %p584_p8, %p578_p5 }
  0x18   :  { %588 = shalt.err (!%p585_p9)
}
  0x19   :  { %37 = dma.hbm_to_vmem [thread:$0]  %s900_s1, 1024, %s32_s23, [#allocation6], %s638_s18, %s638_s18, %s639_s19  }
  0x1a   :  { %629 = dma.done.wait [#allocation3], 2048  }
  0x1b   :  { %630 = vsyncadd [#allocation3], 4294965248 }
  0x1c   :  { %631 = dma.done.wait [#allocation6], 1024  }
  0x1d   :  { %632 = vsyncadd [#allocation6], 4294966272  ;;  %v68_v0 = vlaneseq  ;;  %v179_v2 = vld [vmem:[#allocation2] sm:$0xff]  ;;  %v180_v3 = vld [vmem:[#allocation2 + $0x8] sm:$0xff] }
  0x1e   :  { %v181_v4 = vld [vmem:[#allocation2 + $0x10] sm:$0xff]  ;;  %v679_v6 = vmul.f32 10.0, %v179_v2  ;;  %v681_v7 = vmul.f32 10.0, %v180_v3  ;;  %v182_v8 = vld [vmem:[#allocation2 + $0x18] sm:$0xff]  ;;  %v241_v10 = vld [vmem:[#allocation2 + $0x20] sm:$0xff] }
  0x1f   :  { %v676_v1 = vshrl.u32 %v68_v0, 7  ;;  %v683_v9 = vmul.f32 10.0, %v181_v4  ;;  %v242_v11 = vld [vmem:[#allocation2 + $0x28] sm:$0xff]  ;;  %v685_v12 = vmul.f32 10.0, %v182_v8  ;;  %v687_v13 = vmul.f32 10.0, %v241_v10  ;;  %v243_v15 = vld [vmem:[#allocation2 + $0x30] sm:$0xff] }
  0x20   :  { %v689_v14 = vmul.f32 10.0, %v242_v11  ;;  %v244_v16 = vld [vmem:[#allocation2 + $0x38] sm:$0xff]  ;;  %v303_v17 = vld [vmem:[#allocation2 + $0x40] sm:$0xff]  ;;  %v187_v18 = vmax.f32 %v679_v6, %v681_v7  ;;  %v693_v19 = vmul.f32 10.0, %v243_v15  ;;  %v304_v21 = vld [vmem:[#allocation2 + $0x48] sm:$0xff]  ;;  %vm431_vm0 = vcmp.lt.s32.totalorder %v68_v0, 256 }
  0x21   :  { %v70_v5 = vsub.s32 0, %v676_v1  ;;  %v695_v20 = vmul.f32 10.0, %v244_v16  ;;  %v305_v22 = vld [vmem:[#allocation2 + $0x50] sm:$0xff]  ;;  %v306_v23 = vld [vmem:[#allocation2 + $0x58] sm:$0xff]  ;;  %v74_v24 = vsub.s32 1, %v676_v1  ;;  %v190_v25 = vmax.f32 %v683_v9, %v685_v12  ;;  %v348_v28 = vld [vmem:[#allocation2 + $0x60] sm:$0xff] }
  0x22   :  { %v700_v26 = vmul.f32 10.0, %v303_v17  ;;  %v702_v27 = vmul.f32 10.0, %v304_v21  ;;  %188 = vmax.xlane.f32.xlu0 %v187_v18  ;;  %v249_v29 = vmax.f32 %v687_v13, %v689_v14  ;;  %v349_v30 = vld [vmem:[#allocation2 + $0x68] sm:$0xff]  ;;  %v350_v31 = vld [vmem:[#allocation2 + $0x70] sm:$0xff]  ;;  %v46_v32 = vld [vmem:[%s901_s2] sm:$0x3] }
  0x23   :  { %191 = vmax.xlane.f32.xlu1 %v190_v25  ;;  %v252_v33 = vmax.f32 %v693_v19, %v695_v20  ;;  %v711_v34 = vmul.f32 10.0, %v305_v22  ;;  %v713_v35 = vmul.f32 10.0, %v306_v23  ;;  %v351_v36 = vld [vmem:[#allocation2 + $0x78] sm:$0xff]  ;;  %v71_v37 = vrot.slane %v46_v32, %v70_v5  ;;  %v117_v38 = vld [vmem:[#allocation5 + $0x20] sm:$0xff]  ;;  %v118_v39 = vld [vmem:[#allocation5 + $0x28] sm:$0xff]  ;;  %s642_s2 = smov [#allocation8]  }
  0x24   :  { %v75_v40 = vrot.slane %v46_v32, %v74_v24  ;;  %v49_v41 = vld [vmem:[#allocation5 + $0x10] sm:$0xff]  ;;  %v47_v42 = vld [vmem:[#allocation5] sm:$0xff]  ;;  %v48_v43 = vld [vmem:[#allocation5 + $0x8] sm:$0xff]  ;;  %v311_v44 = vmax.f32 %v700_v26, %v702_v27  ;;  %v717_v45 = vmul.f32 10.0, %v348_v28  ;;  %v719_v46 = vmul.f32 10.0, %v349_v30  ;;  %s450_s27 = sshll.u32 %s642_s2, 4  ;;  %s451_s27 = int_to_ptr.vmem [resolvable:$true] %s450_s27 }
  0x25   :  { %v50_v47 = vld [vmem:[#allocation5 + $0x18] sm:$0xff]  ;;  %v721_v48 = vadd.f32 %v49_v41, %v47_v42  ;;  %v723_v49 = vmul.f32 10.0, %v350_v31  ;;  %v137_v50 = vsub.f32 %v117_v38, %v71_v37  ;;  %v314_v53 = vmax.f32 %v711_v34, %v713_v35  ;;  %v119_v57 = vld [vmem:[#allocation5 + $0x30] sm:$0xff]  ;;  %s589_s28 = scalar_lea.vmem %s451_s27, 32  ;;  %p594_p11 = scmp.lt.s32.totalorder %s451_s27, %s451_s27 }
  0x26   :  { %250 = vmax.xlane.f32.xlu0 %v249_v29  ;;  %v138_v51 = vsub.f32 %v118_v39, %v75_v40  ;;  %v725_v52 = vadd.f32 %v50_v47, %v48_v43  ;;  %v729_v54 = vmul.f32 10.0, %v351_v36  ;;  %v78_v55 = vsub.f32 %v47_v42, %v71_v37  ;;  %v120_v58 = vld [vmem:[#allocation5 + $0x38] sm:$0xff]  ;;  %p590_p10 = scmp.ne.s32.totalorder %s451_s27, %s589_s28  ;;  %p595_p12 = scmp.lt.s32.totalorder %s589_s28, %s589_s28 }
  0x27   :  { %253 = vmax.xlane.f32.xlu1 %v252_v33  ;;  %v79_v56 = vsub.f32 %v48_v43, %v75_v40  ;;  %v356_v59 = vmax.f32 %v717_v45, %v719_v46  ;;  %v733_v60 = vadd.f32 %v119_v57, %v117_v38  ;;  %v735_v61 = vadd.f32 %v120_v58, %v118_v39 }
  0x28   :  { %v737_v62 = vmul.f32 25.0, %v137_v50  ;;  %v739_v63 = vmul.f32 25.0, %v138_v51  ;;  %v80_v2 = vsub.f32 %v49_v41, %v71_v37  ;;  %v81_v3 = vsub.f32 %v50_v47, %v75_v40  ;;  %p596_p13 = por %p595_p12, %p594_p11 }
  0x29   :  { %v359_v4 = vmax.f32 %v723_v49, %v729_v54  ;;  %v743_v5 = vmul.f32 25.0, %v78_v55  ;;  %v745_v8 = vmul.f32 25.0, %v79_v56  ;;  %v139_v10 = vsub.f32 %v119_v57, %v71_v37 }
  0x2a   :  { %312 = vmax.xlane.f32.xlu0 %v311_v44  ;;  %v140_v11 = vsub.f32 %v120_v58, %v75_v40  ;;  %v145_v15 = vmax.f32 %v737_v62, %v739_v63  ;;  %v749_v16 = vmul.f32 25.0, %v80_v2  ;;  %v751_v17 = vmul.f32 25.0, %v81_v3  ;;  %p597_p0 = pnand %p596_p13, %p590_p10 }
  0x2b   :  { %315 = vmax.xlane.f32.xlu1 %v314_v53  ;;  %v86_v18 = vmax.f32 %v743_v5, %v745_v8  ;;  %v755_v21 = vmul.f32 25.0, %v139_v10 }
  0x2c   :  { %v757_v22 = vmul.f32 25.0, %v140_v11  ;;  %v89_v23 = vmax.f32 %v749_v16, %v751_v17 }
  0x2e   :  { %357 = vmax.xlane.f32.xlu0 %v356_v59  ;;  %v148_v24 = vmax.f32 %v755_v21, %v757_v22 }
  0x2f   :  { %360 = vmax.xlane.f32.xlu1 %v359_v4 }
  0x32   :  { %146 = vmax.xlane.f32.xlu0 %v145_v15 }
  0x33   :  { %87 = vmax.xlane.f32.xlu1 %v86_v18 }
  0x36   :  { %90 = vmax.xlane.f32.xlu0 %v89_v23 }
  0x37   :  { %149 = vmax.xlane.f32.xlu1 %v148_v24 }
  0xab   :  { %v189_v25 = vpop.xlane.xlu0 %188 }
  0xac   :  { %v764_v28 = vsub.f32 %v679_v6, %v189_v25  ;;  %v767_v29 = vsub.f32 %v681_v7, %v189_v25  ;;  %v192_v30 = vpop.xlane.xlu1 %191 }
  0xad   :  { %v770_v31 = vsub.f32 %v683_v9, %v192_v30  ;;  %v773_v32 = vsub.f32 %v685_v12, %v192_v30 }
  0xae   :  { %v197_v33 = vmul.f32 1.442695, %v764_v28  ;;  %v199_v36 = vmul.f32 1.442695, %v767_v29 }
  0xaf   :  { %v201_v37 = vmul.f32 1.442695, %v770_v31  ;;  %v203_v38 = vmul.f32 1.442695, %v773_v32  ;;  %v251_v6 = vpop.xlane.xlu0 %250 }
  0xb0   :  { %477 = vpow2.f32 %v197_v33  ;;  %v780_v7 = vsub.f32 %v687_v13, %v251_v6  ;;  %v783_v39 = vsub.f32 %v689_v14, %v251_v6  ;;  %v254_v9 = vpop.xlane.xlu1 %253 }
  0xb1   :  { %479 = vpow2.f32 %v199_v36  ;;  %v786_v12 = vsub.f32 %v693_v19, %v254_v9  ;;  %v789_v40 = vsub.f32 %v695_v20, %v254_v9 }
  0xb2   :  { %481 = vpow2.f32 %v201_v37  ;;  %v259_v41 = vmul.f32 1.442695, %v780_v7  ;;  %v261_v42 = vmul.f32 1.442695, %v783_v39 }
  0xb3   :  { %483 = vpow2.f32 %v203_v38  ;;  %v263_v13 = vmul.f32 1.442695, %v786_v12  ;;  %v265_v43 = vmul.f32 1.442695, %v789_v40  ;;  %v313_v14 = vpop.xlane.xlu0 %312 }
  0xb4   :  { %485 = vpow2.f32 %v259_v41  ;;  %v796_v44 = vsub.f32 %v700_v26, %v313_v14  ;;  %v799_v19 = vsub.f32 %v702_v27, %v313_v14  ;;  %v316_v20 = vpop.xlane.xlu1 %315 }
  0xb5   :  { %487 = vpow2.f32 %v261_v42  ;;  %v802_v47 = vsub.f32 %v711_v34, %v316_v20  ;;  %v805_v50 = vsub.f32 %v713_v35, %v316_v20 }
  0xb6   :  { %489 = vpow2.f32 %v263_v13  ;;  %v321_v51 = vmul.f32 1.442695, %v796_v44  ;;  %v323_v53 = vmul.f32 1.442695, %v799_v19 }
  0xb7   :  { %491 = vpow2.f32 %v265_v43  ;;  %v325_v26 = vmul.f32 1.442695, %v802_v47  ;;  %v327_v55 = vmul.f32 1.442695, %v805_v50  ;;  %v358_v27 = vpop.xlane.xlu0 %357 }
  0xb8   :  { %493 = vpow2.f32 %v321_v51  ;;  %v812_v56 = vsub.f32 %v717_v45, %v358_v27  ;;  %v815_v34 = vsub.f32 %v719_v46, %v358_v27  ;;  %v361_v35 = vpop.xlane.xlu1 %360 }
  0xb9   :  { %495 = vpow2.f32 %v323_v53  ;;  %v818_v57 = vsub.f32 %v723_v49, %v361_v35  ;;  %v821_v58 = vsub.f32 %v729_v54, %v361_v35 }
  0xba   :  { %497 = vpow2.f32 %v325_v26  ;;  %v366_v59 = vmul.f32 1.442695, %v812_v56  ;;  %v368_v2 = vmul.f32 1.442695, %v815_v34 }
  0xbb   :  { %499 = vpow2.f32 %v327_v55  ;;  %v370_v45 = vmul.f32 1.442695, %v818_v57  ;;  %v372_v3 = vmul.f32 1.442695, %v821_v58  ;;  %v147_v46 = vpop.xlane.xlu0 %146 }
  0xbc   :  { %501 = vpow2.f32 %v366_v59  ;;  %v151_v4 = vsub.f32 %v737_v62, %v147_v46  ;;  %v152_v49 = vsub.f32 %v739_v63, %v147_v46  ;;  %v88_v10 = vpop.xlane.xlu1 %87 }
  0xbd   :  { %v478_v11 = vpop.eup %477  ;;  %503 = vpow2.f32 %v368_v2  ;;  %v92_v54 = vsub.f32 %v743_v5, %v88_v10  ;;  %v93_v15 = vsub.f32 %v745_v8, %v88_v10 }
  0xbe   :  { %v480_v18 = vpop.eup %479  ;;  %505 = vpow2.f32 %v370_v45  ;;  %v155_v23 = vmul.f32 1.442695, %v151_v4  ;;  %v157_v24 = vmul.f32 1.442695, %v152_v49 }
  0xbf   :  { %v482_v25 = vpop.eup %481  ;;  %507 = vpow2.f32 %v372_v3  ;;  %v91_v30 = vpop.xlane.xlu0 %90  ;;  %v96_v33 = vmul.f32 1.442695, %v92_v54  ;;  %v98_v36 = vmul.f32 1.442695, %v93_v15  ;;  %v205_v37 = vadd.f32 %v480_v18, %v478_v11 }
  0xc0   :  { %v484_v62 = vpop.eup %483  ;;  %509 = vpow2.f32 %v155_v23  ;;  %v94_v63 = vsub.f32 %v749_v16, %v91_v30  ;;  %v95_v38 = vsub.f32 %v751_v17, %v91_v30  ;;  %v150_v6 = vpop.xlane.xlu1 %149 }
  0xc1   :  { %v486_v5 = vpop.eup %485  ;;  %511 = vpow2.f32 %v157_v24  ;;  %206 = vadd.xlane.f32.xlu0 %v205_v37  ;;  %v153_v8 = vsub.f32 %v755_v21, %v150_v6  ;;  %v154_v9 = vsub.f32 %v757_v22, %v150_v6  ;;  %v208_v41 = vadd.f32 %v484_v62, %v482_v25 }
  0xc2   :  { %v488_v42 = vpop.eup %487  ;;  %v100_v13 = vmul.f32 1.442695, %v94_v63  ;;  %v102_v43 = vmul.f32 1.442695, %v95_v38  ;;  %513 = vpow2.f32 %v96_v33 }
  0xc3   :  { %v490_v14 = vpop.eup %489  ;;  %515 = vpow2.f32 %v98_v36  ;;  %v159_v20 = vmul.f32 1.442695, %v153_v8  ;;  %v161_v51 = vmul.f32 1.442695, %v154_v9  ;;  %v267_v16 = vadd.f32 %v488_v42, %v486_v5 }
  0xc4   :  { %v492_v53 = vpop.eup %491  ;;  %517 = vpow2.f32 %v100_v13 }
  0xc5   :  { %v494_v17 = vpop.eup %493  ;;  %519 = vpow2.f32 %v102_v43  ;;  %209 = vadd.xlane.f32.xlu0 %v208_v41  ;;  %268 = vadd.xlane.f32.xlu1 %v267_v16  ;;  %v270_v26 = vadd.f32 %v492_v53, %v490_v14 }
  0xc6   :  { %v496_v21 = vpop.eup %495  ;;  %521 = vpow2.f32 %v159_v20 }
  0xc7   :  { %v498_v22 = vpop.eup %497  ;;  %523 = vpow2.f32 %v161_v51  ;;  %v329_v55 = vadd.f32 %v496_v21, %v494_v17 }
  0xc8   :  { %v500_v27 = vpop.eup %499 }
  0xc9   :  { %v502_v35 = vpop.eup %501  ;;  %330 = vadd.xlane.f32.xlu0 %v329_v55  ;;  %271 = vadd.xlane.f32.xlu1 %v270_v26  ;;  %v332_v59 = vadd.f32 %v500_v27, %v498_v22 }
  0xca   :  { %v504_v2 = vpop.eup %503 }
  0xcb   :  { %v506_v45 = vpop.eup %505  ;;  %v374_v3 = vadd.f32 %v504_v2, %v502_v35 }
  0xcc   :  { %v508_v46 = vpop.eup %507 }
  0xcd   :  { %v835_v4 = vpop.eup %509  ;;  %375 = vadd.xlane.f32.xlu0 %v374_v3  ;;  %333 = vadd.xlane.f32.xlu1 %v332_v59  ;;  %v377_v49 = vadd.f32 %v508_v46, %v506_v45 }
  0xce   :  { %v837_v10 = vpop.eup %511 }
  0xcf   :  { %v839_v11 = vpop.eup %513  ;;  %v163_v54 = vadd.f32 %v837_v10, %v835_v4 }
  0xd0   :  { %v843_v15 = vpop.eup %515 }
  0xd1   :  { %v845_v18 = vpop.eup %517  ;;  %164 = vadd.xlane.f32.xlu0 %v163_v54  ;;  %378 = vadd.xlane.f32.xlu1 %v377_v49  ;;  %v104_v23 = vadd.f32 %v843_v15, %v839_v11 }
  0xd2   :  { %v849_v24 = vpop.eup %519 }
  0xd3   :  { %v851_v25 = vpop.eup %521  ;;  %v107_v30 = vadd.f32 %v849_v24, %v845_v18 }
  0xd4   :  { %v855_v33 = vpop.eup %523 }
  0xd5   :  { %108 = vadd.xlane.f32.xlu0 %v107_v30  ;;  %105 = vadd.xlane.f32.xlu1 %v104_v23  ;;  %v166_v36 = vadd.f32 %v855_v33, %v851_v25 }
  0xd9   :  { %167 = vadd.xlane.f32.xlu1 %v166_v36 }
 0x14a   :  { %v207_v37 = vpop.xlane.xlu0 %206 }
 0x14e   :  { %v210_v62 = vpop.xlane.xlu0 %209  ;;  %v269_v63 = vpop.xlane.xlu1 %268 }
 0x14f   :  { %525 = vlog2.f32 %v269_v63 }
 0x150   :  { %527 = vlog2.f32 %v207_v37 }
 0x152   :  { %v331_v38 = vpop.xlane.xlu0 %330  ;;  %v272_v6 = vpop.xlane.xlu1 %271 }
 0x153   :  { %529 = vlog2.f32 %v331_v38 }
 0x154   :  { %531 = vlog2.f32 %v272_v6 }
 0x155   :  { %533 = vlog2.f32 %v210_v62 }
 0x156   :  { %v376_v5 = vpop.xlane.xlu0 %375  ;;  %v334_v8 = vpop.xlane.xlu1 %333 }
 0x157   :  { %535 = vlog2.f32 %v376_v5 }
 0x158   :  { %537 = vlog2.f32 %v334_v8 }
 0x15a   :  { %v165_v9 = vpop.xlane.xlu0 %164  ;;  %v379_v41 = vpop.xlane.xlu1 %378 }
 0x15b   :  { %539 = vrcp.f32 %v165_v9 }
 0x15c   :  { %541 = vlog2.f32 %v379_v41  ;;  %v526_v42 = vpop.eup %525 }
 0x15d   :  { %v528_v14 = vpop.eup %527  ;;  %v274_v16 = vmul.f32 0.6931472, %v526_v42 }
 0x15e   :  { %v109_v13 = vpop.xlane.xlu0 %108  ;;  %v106_v43 = vpop.xlane.xlu1 %105  ;;  %v212_v26 = vmul.f32 0.6931472, %v528_v14 }
 0x15f   :  { %543 = vrcp.f32 %v109_v13  ;;  %v277_v35 = vsub.f32 %v274_v16, %v780_v7  ;;  %v278_v45 = vsub.f32 %v274_v16, %v783_v39 }
 0x160   :  { %v530_v20 = vpop.eup %529  ;;  %545 = vrcp.f32 %v106_v43  ;;  %v215_v3 = vsub.f32 %v212_v26, %v764_v28  ;;  %v216_v23 = vsub.f32 %v212_v26, %v767_v29 }
 0x161   :  { %v532_v51 = vpop.eup %531  ;;  %v336_v21 = vmul.f32 0.6931472, %v530_v20 }
 0x162   :  { %v168_v53 = vpop.xlane.xlu1 %167  ;;  %v534_v17 = vpop.eup %533  ;;  %v276_v55 = vmul.f32 0.6931472, %v532_v51  ;;  %v281_v7 = vadd.f32 %v277_v35, %v215_v3  ;;  %v282_v38 = vadd.f32 %v278_v45, %v216_v23 }
 0x163   :  { %547 = vrcp.f32 %v168_v53  ;;  %v214_v2 = vmul.f32 0.6931472, %v534_v17  ;;  %v339_v46 = vsub.f32 %v336_v21, %v796_v44  ;;  %v340_v30 = vsub.f32 %v336_v21, %v799_v19 }
 0x164   :  { %v536_v22 = vpop.eup %535  ;;  %v279_v36 = vsub.f32 %v276_v55, %v786_v12  ;;  %v280_v37 = vsub.f32 %v276_v55, %v789_v40 }
 0x165   :  { %v538_v27 = vpop.eup %537  ;;  %v381_v59 = vmul.f32 0.6931472, %v536_v22  ;;  %v217_v44 = vsub.f32 %v214_v2, %v770_v31  ;;  %v218_v29 = vsub.f32 %v214_v2, %v773_v32  ;;  %v343_v19 = vadd.f32 %v339_v46, %v281_v7 }
 0x166   :  { %v338_v49 = vmul.f32 0.6931472, %v538_v27  ;;  %v344_v8 = vadd.f32 %v340_v30, %v282_v38 }
 0x167   :  { %v384_v63 = vsub.f32 %v381_v59, %v812_v56  ;;  %v385_v6 = vsub.f32 %v381_v59, %v815_v34  ;;  %v283_v9 = vadd.f32 %v279_v36, %v217_v44  ;;  %v284_v41 = vadd.f32 %v280_v37, %v218_v29 }
 0x168   :  { %v540_v54 = vpop.eup %539  ;;  %v341_v12 = vsub.f32 %v338_v49, %v802_v47 }
 0x169   :  { %v542_v62 = vpop.eup %541  ;;  %v171_v39 = vmul.f32 %v540_v54, %v835_v4  ;;  %v172_v28 = vmul.f32 %v540_v54, %v837_v10  ;;  %v388_v42 = vadd.f32 %v384_v63, %v343_v19  ;;  %v342_v4 = vsub.f32 %v338_v49, %v805_v50 }
 0x16a   :  { %v383_v5 = vmul.f32 0.6931472, %v542_v62  ;;  %v389_v31 = vadd.f32 %v385_v6, %v344_v8  ;;  %v345_v14 = vadd.f32 %v341_v12, %v283_v9  ;;  %v59_v63 = vrot.slane %v725_v52, 4 }
 0x16b   :  { %v285_v10 = vmul.f32 %v277_v35, %v171_v39  ;;  %v286_v13 = vmul.f32 %v278_v45, %v172_v28 }
 0x16c   :  { %v544_v40 = vpop.eup %543  ;;  %v386_v47 = vsub.f32 %v383_v5, %v818_v57  ;;  %v387_v20 = vsub.f32 %v383_v5, %v821_v58 }
 0x16d   :  { %v546_v56 = vpop.eup %545  ;;  %v114_v32 = vmul.f32 %v544_v40, %v845_v18  ;;  %v115_v51 = vmul.f32 %v544_v40, %v849_v24  ;;  %v289_v22 = vadd.f32 %v286_v13, %v285_v10 }
 0x16e   :  { %v112_v43 = vmul.f32 %v546_v56, %v839_v11  ;;  %v113_v34 = vmul.f32 %v546_v56, %v843_v15  ;;  %v346_v15 = vadd.f32 %v342_v4, %v284_v41  ;;  %v390_v2 = vadd.f32 %v386_v47, %v345_v14 }
 0x16f   :  { %v225_v55 = vmul.f32 %v217_v44, %v114_v32  ;;  %v226_v24 = vmul.f32 %v218_v29, %v115_v51  ;;  %v60_v44 = vadd.f32 %v59_v63, %v725_v52 }
 0x170   :  { %v548_v16 = vpop.eup %547  ;;  %v223_v53 = vmul.f32 %v215_v3, %v112_v43  ;;  %v224_v17 = vmul.f32 %v216_v23, %v113_v34  ;;  %v175_v50 = vadd.f32 %v171_v39, %v112_v43  ;;  %v176_v26 = vadd.f32 %v172_v28, %v113_v34 }
 0x171   :  { %v173_v21 = vmul.f32 %v548_v16, %v851_v25  ;;  %v174_v11 = vmul.f32 %v548_v16, %v855_v33  ;;  %v391_v3 = vadd.f32 %v387_v20, %v346_v15  ;;  %v122_v39 = vrot.slane %v733_v60, 4 }
 0x172   :  { %v227_v18 = vadd.f32 %v224_v17, %v223_v53  ;;  %v392_v27 = vmul.f32 %v388_v42, %v175_v50  ;;  %v393_v35 = vmul.f32 %v389_v31, %v176_v26  ;;  %v129_v28 = vrot.slane %v735_v61, 4 }
 0x173   :  { %v287_v57 = vmul.f32 %v279_v36, %v173_v21  ;;  %v177_v59 = vadd.f32 %v173_v21, %v114_v32  ;;  %v178_v58 = vadd.f32 %v174_v11, %v115_v51  ;;  %v288_v46 = vmul.f32 %v280_v37, %v174_v11 }
 0x174   :  { %v228_v45 = vadd.f32 %v227_v18, %v225_v55  ;;  %v396_v23 = vadd.f32 %v393_v35, %v392_v27  ;;  %v52_v36 = vrot.slane %v721_v48, 4  ;;  %v123_v38 = vadd.f32 %v122_v39, %v733_v60 }
 0x175   :  { %v290_v49 = vadd.f32 %v289_v22, %v287_v57  ;;  %v394_v54 = vmul.f32 %v390_v2, %v177_v59  ;;  %v395_v33 = vmul.f32 %v391_v3, %v178_v58  ;;  %v130_v6 = vadd.f32 %v129_v28, %v735_v61 }
 0x176   :  { %v229_v25 = vadd.f32 %v228_v45, %v226_v24  ;;  %v53_v37 = vadd.f32 %v52_v36, %v721_v48  ;;  %v61_v19 = vrot.slane %v60_v44, 2  ;;  %v124_v12 = vrot.slane %v123_v38, 2 }
 0x177   :  { %v291_v30 = vadd.f32 %v290_v49, %v288_v46  ;;  %v397_v62 = vadd.f32 %v396_v23, %v394_v54  ;;  %v131_v5 = vrot.slane %v130_v6, 2  ;;  %v641_v43 = vmov 1966171168  }
 0x178   :  { %230 = vadd.xlane.f32.xlu0 %v229_v25  ;;  %v54_v29 = vrot.slane %v53_v37, 2  ;;  %v62_v8 = vadd.f32 %v61_v19, %v60_v44  ;;  %v125_v9 = vadd.f32 %v124_v12, %v123_v38  ;;  %v415_v60 = vunpack.c.l.s4 %v641_v43 }
 0x179   :  { %292 = vadd.xlane.f32.xlu1 %v291_v30  ;;  %v398_v7 = vadd.f32 %v397_v62, %v395_v33  ;;  %v132_v41 = vadd.f32 %v131_v5, %v130_v6 }
 0x17a   :  { %v55_v40 = vadd.f32 %v54_v29, %v53_v37  ;;  %v63_v42 = vrot.slane %v62_v8, 1  ;;  %v126_v4 = vrot.slane %v125_v9, 1  ;;  %v416_v32 = vunpack.c.0.s8 %v415_v60 }
 0x17b   :  { %v133_v10 = vrot.slane %v132_v41, 1 }
 0x17c   :  { %399 = vadd.xlane.f32.xlu0 %v398_v7  ;;  %v56_v56 = vrot.slane %v55_v40, 1  ;;  %v64_v48 = vadd.f32 %v63_v42, %v62_v8  ;;  %v127_v31 = vadd.f32 %v126_v4, %v125_v9  ;;  %v419_v47 = vsub.s32 %v416_v32, %v676_v1 }
 0x17d   :  { %v134_v52 = vadd.f32 %v133_v10, %v132_v41 }
 0x17e   :  { %v57_v13 = vadd.f32 %v56_v56, %v55_v40 }
 0x17f   :  { %v136_v61 = vadd.f32 %v134_v52, %v64_v48 }
 0x180   :  { %v135_v34 = vadd.f32 %v127_v31, %v57_v13 }
 0x182   :  { %v413_v14 = vcombine.low %v135_v34, %v136_v61 }
 0x184   :  { %v420_v20 = vrot.slane %v413_v14, %v419_v47 }
 0x186   :  { %v427_v51 = vrot.slane %v420_v20, %v419_v47 }
 0x188   :  { %433 = vst.msk [vmem:[#allocation8] sm:$0x3] %vm431_vm0, %v427_v51 }
 0x189   :  { %600 = shalt.err (!%p597_p0)
}
 0x18a   :  { %453 = dma.vmem_to_hbm [thread:$0]  %s451_s27, 32, %s903_s4, [#allocation9]  }
 0x18b   :  { %s643_s7 = smov [#allocation7]  }
 0x18c   :  { %s440_s8 = sshll.u32 %s643_s7, 4  ;;  %s441_s8 = int_to_ptr.vmem [resolvable:$true] %s440_s8 }
 0x18d   :  { %s609_s11 = scalar_lea.vmem %s441_s8, 16  ;;  %s613_s12 = scalar_lea.vmem %s441_s8, 32 }
 0x18e   :  { %p610_p1 = scmp.ne.s32.totalorder %s441_s8, %s609_s11  ;;  %p614_p2 = scmp.lt.s32.totalorder %s441_s8, %s441_s8 }
 0x18f   :  { %p615_p3 = scmp.lt.s32.totalorder %s613_s12, %s609_s11 }
 0x191   :  { %p616_p4 = por %p615_p3, %p614_p2 }
 0x193   :  { %p617_p5 = pnand %p616_p4, %p610_p1 }
 0x201   :  { %v231_v1 = vpop.xlane.xlu0 %230 }
 0x202   :  { %v232_v16 = vrot.slane %v231_v1, 4  ;;  %v293_v53 = vpop.xlane.xlu1 %292 }
 0x203   :  { %v294_v17 = vrot.slane %v293_v53, 4 }
 0x204   :  { %v233_v0 = vadd.f32 %v232_v16, %v231_v1 }
 0x205   :  { %v295_v50 = vadd.f32 %v294_v17, %v293_v53  ;;  %v400_v26 = vpop.xlane.xlu0 %399 }
 0x206   :  { %v234_v21 = vrot.slane %v233_v0, 2  ;;  %v401_v11 = vrot.slane %v400_v26, 4 }
 0x207   :  { %v296_v22 = vrot.slane %v295_v50, 2 }
 0x208   :  { %v402_v15 = vadd.f32 %v401_v11, %v400_v26  ;;  %v235_v55 = vadd.f32 %v234_v21, %v233_v0 }
 0x209   :  { %v297_v18 = vadd.f32 %v296_v22, %v295_v50 }
 0x20a   :  { %v403_v27 = vrot.slane %v402_v15, 2  ;;  %v236_v35 = vrot.slane %v235_v55, 1 }
 0x20b   :  { %v298_v57 = vrot.slane %v297_v18, 1 }
 0x20c   :  { %v404_v59 = vadd.f32 %v403_v27, %v402_v15  ;;  %v237_v58 = vadd.f32 %v236_v35, %v235_v55 }
 0x20d   :  { %v299_v2 = vadd.f32 %v298_v57, %v297_v18 }
 0x20e   :  { %464 = vpush %v237_v58  ;;  %v405_v24 = vrot.slane %v404_v59, 1 }
 0x20f   :  { %466 = vpush %v299_v2 }
 0x210   :  { %v406_v45 = vadd.f32 %v405_v24, %v404_v59 }
 0x212   :  { %468 = vpush %v406_v45 }
 0x23f   :  { %s465_s4 = spop %464 }
 0x240   :  { %s467_s5 = spop %466 }
 0x241   :  { %s301_s6 = sadd.f32 %s467_s5, %s465_s4 }
 0x243   :  { %s469_s9 = spop %468 }
 0x244   :  { %s408_s10 = ssub.f32 %s469_s9, %s301_s6 }
 0x246   :  { %v409_v3 = vstv %s408_s10 }
 0x247   :  { %410 = vst [vmem:[#allocation7] sm:$0x1] %v409_v3 }
 0x248   :  { %620 = shalt.err (!%p617_p5)
}
 0x249   :  { %443 = dma.vmem_to_hbm [thread:$0]  %s441_s8, 16, %s902_s3, [#allocation4]  }
 0x24a   :  { %633 = dma.done.wait [#allocation4], 16  }
 0x24b   :  { %634 = vsyncadd [#allocation4], 4294967280 }
 0x24c   :  { %635 = dma.done.wait [#allocation9], 32  }
 0x24d   :  { %636 = vsyncadd [#allocation9], 4294967264 }
 0x24e   :  { %460 = vsyncpa [#allocation3], 1 }
 0x24f   :  { %461 = vsyncpa [#allocation6], 1 }
 0x250   :  { %462 = vsyncpa [#allocation4], 1 }
 0x251   :  { %463 = vsyncpa [#allocation9], 1 }

</bundles_post_ra>
